<compile_context>
chip_gen: v6e
topology: v6e:2x2x1
jax: 0.10.0
libtpu: 0.0.40
codegen_flags: <defaults>
</compile_context>

<pallas_src>
import jax
import jax.numpy as jnp
from jax.experimental import pallas as pl
from jax.experimental.pallas import tpu as pltpu

SUBLANE = 8


def _round_up(n, m):
    return ((n + m - 1) // m) * m


def dqn_kernel(x_ref, w1_ref, b1_ref, w2_ref, b2_ref, w3_ref, b3_ref, o_ref):
    tb = x_ref.shape[0]
    # Sub-chunk the batch tile to bound vreg live ranges (h1/h2 are (chunk,16)).
    chunk = 256 if (tb % 256 == 0) else tb
    n_chunks = tb // chunk

    w1 = w1_ref[...]
    b1 = b1_ref[...]
    w2 = w2_ref[...]
    b2 = b2_ref[...]
    w3 = w3_ref[...]
    b3 = b3_ref[...]

    # n_chunks is a trace-time constant -> static unroll with static slices.
    for c in range(n_chunks):
        rows = pl.ds(c * chunk, chunk)
        xs = x_ref[rows, :]
        h1 = jnp.maximum(
            jnp.dot(xs, w1, preferred_element_type=jnp.float32) + b1, 0.0)
        h2 = jnp.maximum(
            jnp.dot(h1, w2, preferred_element_type=jnp.float32) + b2, 0.0)
        out = jnp.dot(h2, w3, preferred_element_type=jnp.float32) + b3
        o_ref[rows, :] = out.astype(o_ref.dtype)


def dqn_forward(x, params, *, tile_b=2048):
    """x: [B, D_in] float32. params: w1,b1,w2,b2,w3,b3 (w: [in,out], b: [1,out])."""
    w1, b1, w2, b2, w3, b3 = (params[k] for k in ("w1", "b1", "w2", "b2", "w3", "b3"))
    B, d_in = x.shape
    num_actions = w3.shape[1]

    # Batch tile: multiple of 8 sublanes; whole batch in one tile when small.
    tb = tile_b if B >= tile_b else max(SUBLANE, _round_up(B, SUBLANE))
    grid = (pl.cdiv(B, tb),)

    # Weights / biases: full blocks, constant index_map -> VMEM-resident
    # across all batch tiles.
    const = lambda a: pl.BlockSpec(a.shape, lambda i: (0,) * a.ndim)

    return pl.pallas_call(
        dqn_kernel,
        out_shape=jax.ShapeDtypeStruct((B, num_actions), jnp.float32),
        grid=grid,
        in_specs=[
            pl.BlockSpec((tb, d_in), lambda i: (i, 0)),   # x: tiled over batch
            const(w1), const(b1),
            const(w2), const(b2),
            const(w3), const(b3),
        ],
        out_specs=pl.BlockSpec((tb, num_actions), lambda i: (i, 0)),
        compiler_params=pltpu.CompilerParams(
            dimension_semantics=("parallel",)),  # megacore sharding on v7x
    )(x.astype(jnp.float32), w1, b1, w2, b2, w3, b3)


def init_params(key, input_dim, num_actions):
    """Deterministic init mimicking nn.Linear's U(-1/sqrt(fan_in), 1/sqrt(fan_in))."""
    def linear(k, fan_in, fan_out):
        kw, kb = jax.random.split(k)
        bound = 1.0 / (fan_in ** 0.5)
        w = jax.random.uniform(kw, (fan_in, fan_out), jnp.float32, -bound, bound)
        b = jax.random.uniform(kb, (1, fan_out), jnp.float32, -bound, bound)
        return w, b

    k1, k2, k3 = jax.random.split(key, 3)
    w1, b1 = linear(k1, input_dim, 16)
    w2, b2 = linear(k2, 16, 16)
    w3, b3 = linear(k3, 16, num_actions)
    return {"w1": w1, "b1": b1, "w2": w2, "b2": b2, "w3": w3, "b3": b3}


def dqn_reference(x, p):
    h1 = jnp.maximum(x @ p["w1"] + p["b1"], 0.0)
    h2 = jnp.maximum(h1 @ p["w2"] + p["b2"], 0.0)
    return h2 @ p["w3"] + p["b3"]


if __name__ == "__main__":
    key = jax.random.PRNGKey(0)
    k_params, k_x, k_x2, k_x3 = jax.random.split(key, 4)

    input_dim = 4       # input_shape[0] (state feature dimension)
    num_actions = 2
    params = init_params(k_params, input_dim, num_actions)

    # Small batch: single tile (rounded up to 8 sublanes), single grid step.
    batch = 8
    x = jax.random.normal(k_x, (batch, input_dim), jnp.float32)
    out = jax.block_until_ready(dqn_forward(x, params))
    ref = dqn_reference(x, params)
    assert out.shape == (batch, num_actions)
    assert jnp.allclose(out, ref, atol=1e-5, rtol=1e-5), "mismatch (small batch)"

    # Non-aligned batch with a small tile: exercises the ragged edge block
    # (last block partially out of bounds, masked on writeback).
    batch2 = 200
    x2 = jax.random.normal(k_x2, (batch2, input_dim), jnp.float32)
    out2 = jax.block_until_ready(dqn_forward(x2, params, tile_b=64))
    ref2 = dqn_reference(x2, params)
    assert out2.shape == (batch2, num_actions)
    assert jnp.allclose(out2, ref2, atol=1e-5, rtol=1e-5), "mismatch (ragged grid)"

    # Larger batch: multi-tile parallel grid + in-kernel 256-row sub-chunking.
    batch3 = 1024
    x3 = jax.random.normal(k_x3, (batch3, input_dim), jnp.float32)
    out3 = jax.block_until_ready(dqn_forward(x3, params, tile_b=512))
    ref3 = dqn_reference(x3, params)
    assert out3.shape == (batch3, num_actions)
    assert jnp.allclose(out3, ref3, atol=1e-5, rtol=1e-5), "mismatch (chunked tiles)"

    print("KERNEL_OK")
</pallas_src>

<mosaic_0001>
module attributes {stable_mosaic.version = 11 : i64} {
  func.func @dqn_kernel(%arg0: i32, %arg1: memref<8x4xf32, #tpu.memory_space<vmem>>, %arg2: memref<4x16xf32, #tpu.memory_space<vmem>>, %arg3: memref<1x16xf32, #tpu.memory_space<vmem>>, %arg4: memref<16x16xf32, #tpu.memory_space<vmem>>, %arg5: memref<1x16xf32, #tpu.memory_space<vmem>>, %arg6: memref<16x2xf32, #tpu.memory_space<vmem>>, %arg7: memref<1x2xf32, #tpu.memory_space<vmem>>, %arg8: memref<8x2xf32, #tpu.memory_space<vmem>>) attributes {dimension_semantics = [#tpu.dimension_semantics<parallel>], iteration_bounds = array<i64: 1>, scalar_prefetch = 0 : i64, scratch_operands = 0 : i64, tpu.core_type = #tpu.core_type<tc>, window_params = [{transform_indices = @transform_0, window_bounds = array<i64: 8, 4>}, {pipeline_mode = #tpu.pipeline_mode<synchronous>, transform_indices = @transform_1, window_bounds = array<i64: 4, 16>}, {pipeline_mode = #tpu.pipeline_mode<synchronous>, transform_indices = @transform_2, window_bounds = array<i64: 1, 16>}, {pipeline_mode = #tpu.pipeline_mode<synchronous>, transform_indices = @transform_3, window_bounds = array<i64: 16, 16>}, {pipeline_mode = #tpu.pipeline_mode<synchronous>, transform_indices = @transform_4, window_bounds = array<i64: 1, 16>}, {pipeline_mode = #tpu.pipeline_mode<synchronous>, transform_indices = @transform_5, window_bounds = array<i64: 16, 2>}, {pipeline_mode = #tpu.pipeline_mode<synchronous>, transform_indices = @transform_6, window_bounds = array<i64: 1, 2>}, {transform_indices = @transform_7, window_bounds = array<i64: 8, 2>}]} {
    %c0 = arith.constant 0 : index
    %c0_0 = arith.constant 0 : index
    %0 = vector.load %arg2[%c0, %c0_0] : memref<4x16xf32, #tpu.memory_space<vmem>>, vector<4x16xf32>
    %c0_1 = arith.constant 0 : index
    %c0_2 = arith.constant 0 : index
    %1 = vector.load %arg3[%c0_1, %c0_2] : memref<1x16xf32, #tpu.memory_space<vmem>>, vector<1x16xf32>
    %c0_3 = arith.constant 0 : index
    %c0_4 = arith.constant 0 : index
    %2 = vector.load %arg4[%c0_3, %c0_4] : memref<16x16xf32, #tpu.memory_space<vmem>>, vector<16x16xf32>
    %c0_5 = arith.constant 0 : index
    %c0_6 = arith.constant 0 : index
    %3 = vector.load %arg5[%c0_5, %c0_6] : memref<1x16xf32, #tpu.memory_space<vmem>>, vector<1x16xf32>
    %c0_7 = arith.constant 0 : index
    %c0_8 = arith.constant 0 : index
    %4 = vector.load %arg6[%c0_7, %c0_8] : memref<16x2xf32, #tpu.memory_space<vmem>>, vector<16x2xf32>
    %c0_9 = arith.constant 0 : index
    %c0_10 = arith.constant 0 : index
    %5 = vector.load %arg7[%c0_9, %c0_10] : memref<1x2xf32, #tpu.memory_space<vmem>>, vector<1x2xf32>
    %c0_11 = arith.constant 0 : index
    %c0_12 = arith.constant 0 : index
    %6 = vector.load %arg1[%c0_11, %c0_12] : memref<8x4xf32, #tpu.memory_space<vmem>>, vector<8x4xf32>
    %cst = arith.constant dense<0.000000e+00> : vector<8x16xf32>
    %7 = tpu.matmul %6, %0, %cst {dimension_numbers = #tpu.dot_dimension_numbers<[1], [0], [0], [1], [0, 0, 1, 1], [], []>} : vector<8x4xf32>, vector<4x16xf32>, vector<8x16xf32> -> vector<8x16xf32>
    %8 = vector.broadcast %1 : vector<1x16xf32> to vector<8x16xf32>
    %9 = arith.addf %7, %8 : vector<8x16xf32>
    %cst_13 = arith.constant 0.000000e+00 : f32
    %10 = vector.broadcast %cst_13 : f32 to vector<8x16xf32>
    %11 = arith.maximumf %9, %10 : vector<8x16xf32>
    %cst_14 = arith.constant dense<0.000000e+00> : vector<8x16xf32>
    %12 = tpu.matmul %11, %2, %cst_14 {dimension_numbers = #tpu.dot_dimension_numbers<[1], [0], [0], [1], [0, 0, 1, 1], [], []>} : vector<8x16xf32>, vector<16x16xf32>, vector<8x16xf32> -> vector<8x16xf32>
    %13 = vector.broadcast %3 : vector<1x16xf32> to vector<8x16xf32>
    %14 = arith.addf %12, %13 : vector<8x16xf32>
    %cst_15 = arith.constant 0.000000e+00 : f32
    %15 = vector.broadcast %cst_15 : f32 to vector<8x16xf32>
    %16 = arith.maximumf %14, %15 : vector<8x16xf32>
    %cst_16 = arith.constant dense<0.000000e+00> : vector<8x2xf32>
    %17 = tpu.matmul %16, %4, %cst_16 {dimension_numbers = #tpu.dot_dimension_numbers<[1], [0], [0], [1], [0, 0, 1, 1], [], []>} : vector<8x16xf32>, vector<16x2xf32>, vector<8x2xf32> -> vector<8x2xf32>
    %18 = vector.broadcast %5 : vector<1x2xf32> to vector<8x2xf32>
    %19 = arith.addf %17, %18 : vector<8x2xf32>
    %c0_17 = arith.constant 0 : index
    %c0_18 = arith.constant 0 : index
    %20 = vector.load %arg8[%c0_17, %c0_18] : memref<8x2xf32, #tpu.memory_space<vmem>>, vector<8x2xf32>
    tpu.vector_store %arg8[%c0_17, %c0_18], %19 {strides = array<i32>} : memref<8x2xf32, #tpu.memory_space<vmem>>, vector<8x2xf32>,
    return
  }
  func.func @transform_0(%arg0: i32) -> (i32, i32) {
    %c0_i32 = arith.constant 0 : i32
    %c0_i32_0 = arith.constant 0 : i32
    return %arg0, %c0_i32 : i32, i32
  }
  func.func @transform_1(%arg0: i32) -> (i32, i32) {
    %c0_i32 = arith.constant 0 : i32
    %c0_i32_0 = arith.constant 0 : i32
    %c0_i32_1 = arith.constant 0 : i32
    return %c0_i32, %c0_i32_0 : i32, i32
  }
  func.func @transform_2(%arg0: i32) -> (i32, i32) {
    %c0_i32 = arith.constant 0 : i32
    %c0_i32_0 = arith.constant 0 : i32
    %c0_i32_1 = arith.constant 0 : i32
    return %c0_i32, %c0_i32_0 : i32, i32
  }
  func.func @transform_3(%arg0: i32) -> (i32, i32) {
    %c0_i32 = arith.constant 0 : i32
    %c0_i32_0 = arith.constant 0 : i32
    %c0_i32_1 = arith.constant 0 : i32
    return %c0_i32, %c0_i32_0 : i32, i32
  }
  func.func @transform_4(%arg0: i32) -> (i32, i32) {
    %c0_i32 = arith.constant 0 : i32
    %c0_i32_0 = arith.constant 0 : i32
    %c0_i32_1 = arith.constant 0 : i32
    return %c0_i32, %c0_i32_0 : i32, i32
  }
  func.func @transform_5(%arg0: i32) -> (i32, i32) {
    %c0_i32 = arith.constant 0 : i32
    %c0_i32_0 = arith.constant 0 : i32
    %c0_i32_1 = arith.constant 0 : i32
    return %c0_i32, %c0_i32_0 : i32, i32
  }
  func.func @transform_6(%arg0: i32) -> (i32, i32) {
    %c0_i32 = arith.constant 0 : i32
    %c0_i32_0 = arith.constant 0 : i32
    %c0_i32_1 = arith.constant 0 : i32
    return %c0_i32, %c0_i32_0 : i32, i32
  }
  func.func @transform_7(%arg0: i32) -> (i32, i32) {
    %c0_i32 = arith.constant 0 : i32
    %c0_i32_0 = arith.constant 0 : i32
    return %arg0, %c0_i32 : i32, i32
  }
}

</mosaic_0001>

<bundles_post_ra>
// kernel: tpu_custom_call.1
= control target key start
LH: loop header
LB: loop body
LE: loop exit
PB: predicated region body
PF: predicated region fallthrough
CT: control target
= control target key end

     0   :  { %vm45_vm0 = vcmask 1043456   ;;  %vm41_vm1 = vcmask 31744   ;;  %v322_v0 = vmov 0.0   ;;  %vm323_vm2 = vmmov 0   ;;  %s394_s1 = inlined_call_operand.vmem [shape: f32[4,16], index: 1, kind: input, shape index: {}]   ;;  %s395_s0 = inlined_call_operand.vmem [shape: f32[8,4], index: 0, kind: input, shape index: {}]   ;;  %s396_s3 = inlined_call_operand.vmem [shape: f32[16,16], index: 3, kind: input, shape index: {}]   ;;  %s397_s2 = inlined_call_operand.vmem [shape: f32[1,16], index: 2, kind: input, shape index: {}]   ;;  %s398_s5 = inlined_call_operand.vmem [shape: f32[16,2], index: 5, kind: input, shape index: {}]   ;;  %s399_s4 = inlined_call_operand.vmem [shape: f32[1,16], index: 4, kind: input, shape index: {}]   ;;  %s400_s6 = inlined_call_operand.vmem [shape: f32[1,2], index: 6, kind: input, shape index: {}]   ;;  %s401_s7 = inlined_call_operand.vmem [shape: f32[8,2], index: 7, kind: output, shape index: {}]  }
   0x1   :  { %301 = vmatprep.subr.mxu0 %v322_v0  ;;  %v26_v1 = vld [vmem:[%s394_s1] sm:$0xf]  ;;  %303 = vmatprep.mubr.msk.f32.mxu0 %vm323_vm2, %v322_v0  ;;  %v29_v3 = vld [vmem:[%s396_s3 + $0x8] sm:$0xff]  ;;  %vm126_vm3 = vcmask 130048   ;;  %vm280_vm4 = vcmask 15360  }
   0x2   :  { %v34_v2 = vld [vmem:[%s395_s0] sm:$0xff]  ;;  %302 = vmatpush3.msk.msra.mxu0 %vm45_vm0, %v26_v1  ;;  %306 = vmatprep.subr.mxu1 %v322_v0  ;;  %v32_v10 = vld [vmem:[%s398_s5 + $0x8] sm:$0xff] }
   0x3   :  { %304 = vmatmul.mubr.msk.f32.vlgmr.msra.gmra.mxu0 %vm41_vm1, %v34_v2  ;;  %310 = vmatprep.mubr.msk.f32.mxu1 %vm323_vm2, %v322_v0  ;;  %v28_v4 = vld [vmem:[%s396_s3] sm:$0xff] }
   0x4   :  { %313 = vmatprep.subr.mxu0 %v322_v0  ;;  %317 = vmatprep.mubr.msk.f32.mxu0 %vm323_vm2, %v322_v0  ;;  %v286_v5 = vld [vmem:[%s397_s2] ss:$0 sm:$0xff] }
   0x5   :  { %307 = vmatpush3.msra.mxu1 %v29_v3  ;;  %314 = vmatpush3.msra.mxu0 %v32_v10  ;;  %v31_v11 = vld [vmem:[%s398_s5] sm:$0xff] }
   0x6   :  { %308 = vmatprep.subr.mxu1 %v322_v0  ;;  %315 = vmatprep.subr.mxu0 %v322_v0  ;;  %v289_v12 = vld [vmem:[%s399_s4] ss:$0 sm:$0xff] }
   0x7   :  { %309 = vmatpush3.msra.mxu1 %v28_v4  ;;  %316 = vmatpush3.msra.mxu0 %v31_v11  ;;  %v291_v17 = vld [vmem:[%s400_s6] ss:$0 sm:$0xff] }
  0xc3   :  { %v115_v6 = vpop.f32.mrf.mxu0 }
  0xc4   :  { %v116_v7 = vadd.f32 %v286_v5, %v115_v6 }
  0xc5   :  { %v305_v8 = vpop.f32.mrf.mxu0 }
  0xc6   :  { %v119_v9 = vmax.f32 %v116_v7, 0.0 }
  0xc8   :  { %311 = vmatmul.mubr.msk.f32.vlgmr.msra.gmra.mxu1 %vm126_vm3, %v119_v9 }
 0x188   :  { %v196_v13 = vpop.f32.mrf.mxu1 }
 0x189   :  { %v197_v14 = vadd.f32 %v289_v12, %v196_v13 }
 0x18a   :  { %v312_v15 = vpop.f32.mrf.mxu1 }
 0x18b   :  { %v200_v16 = vmax.f32 %v197_v14, 0.0 }
 0x18d   :  { %318 = vmatmul.mubr.msk.f32.vlgmr.msra.gmra.mxu0 %vm126_vm3, %v200_v16 }
 0x24d   :  { %v276_v18 = vpop.f32.mrf.mxu0 }
 0x24e   :  { %v277_v19 = vadd.f32 %v291_v17, %v276_v18 }
 0x24f   :  { %v319_v20 = vpop.f32.mrf.mxu0 }
 0x250   :  { %281 = vst.msk [vmem:[%s401_s7] sm:$0xff] %vm280_vm4, %v277_v19 }

</bundles_post_ra>
